<compile_context>
chip_gen: v7x
topology: tpu7x:2x2x1
jax: 0.10.0
libtpu: 0.0.40
codegen_flags: <defaults>
</compile_context>

<pallas_src>
import math

import jax
import jax.numpy as jnp
from jax.experimental import pallas as pl
from jax.experimental.pallas import tpu as pltpu

_LANE = 128
_SUBLANE = 8
_MAX_ROW_BLOCK = 512


def _round_up(x, m):
    return ((x + m - 1) // m) * m


def _controller_mlp_kernel(xr_ref, w1_ref, b1_ref, w2_ref, b2_ref, out_ref):
    """One row-block of the fused two-layer sigmoid MLP.

    xr_ref : (Rb, Din)   flattened [x, last_read] rows (T*B collapsed)
    w1_ref : (Din, H)    b1_ref : (1, H)
    w2_ref : (H, Opad)   b2_ref : (1, Opad)     Opad = multiple of 128
    out_ref: (Rb, Opad)  lane-dense store (no masked vst)
    """
    h = jnp.dot(xr_ref[...], w1_ref[...],
                preferred_element_type=jnp.float32) + b1_ref[...]
    h = jax.nn.sigmoid(h)
    o = jnp.dot(h, w2_ref[...],
                preferred_element_type=jnp.float32) + b2_ref[...]
    out_ref[...] = jax.nn.sigmoid(o)


def controller_forward_seq(xr, w1, b1, w2p, b2p, out_dim):
    """Fused multi-timestep forward.

    xr  : (T, B, Din) pre-concatenated [x_t, last_read_t]
    w1  : (Din, H), b1: (1, H)
    w2p : (H, Opad), b2p: (1, Opad)  (columns zero-padded to 128 at init)
    Returns (T, B, out_dim).
    """
    T, B, Din = xr.shape
    H = w1.shape[1]
    Opad = w2p.shape[1]

    rows = T * B
    xr2 = xr.reshape(rows, Din)

    # Row-chunk the flattened (T*B) dimension; pad rows so every block is
    # sublane-aligned.  At small T this degenerates to a single grid step.
    row_block = min(_MAX_ROW_BLOCK, _round_up(rows, _SUBLANE))
    rows_pad = _round_up(rows, row_block)
    if rows_pad != rows:
        xr2 = jnp.pad(xr2, ((0, rows_pad - rows), (0, 0)))
    n_blocks = rows_pad // row_block

    flops = 2 * rows_pad * (Din * H + H * Opad)
    transcendentals = rows_pad * (H + Opad)          # sigmoids (EUP exp)
    bytes_accessed = 4 * (rows_pad * Din + w1.size + b1.size
                          + w2p.size + b2p.size + rows_pad * Opad)

    out = pl.pallas_call(
        _controller_mlp_kernel,
        out_shape=jax.ShapeDtypeStruct((rows_pad, Opad), jnp.float32),
        grid=(n_blocks,),
        in_specs=[
            # Activations stream through VMEM in row blocks.
            pl.BlockSpec((row_block, Din), lambda r: (r, 0)),
            # Parameters: constant block index -> DMA'd once, VMEM-resident
            # across all grid iterations.
            pl.BlockSpec((Din, H), lambda r: (0, 0)),
            pl.BlockSpec((1, H), lambda r: (0, 0)),
            pl.BlockSpec((H, Opad), lambda r: (0, 0)),
            pl.BlockSpec((1, Opad), lambda r: (0, 0)),
        ],
        out_specs=pl.BlockSpec((row_block, Opad), lambda r: (r, 0)),
        compiler_params=pltpu.CompilerParams(
            dimension_semantics=(("parallel",) if n_blocks > 1
                                 else ("arbitrary",))),
        cost_estimate=pl.CostEstimate(
            flops=flops,
            transcendentals=transcendentals,
            bytes_accessed=bytes_accessed),
    )(xr2, w1, b1, w2p, b2p)

    return out[:rows, :out_dim].reshape(T, B, out_dim)


def controller_forward(x, last_read, w1, b1, w2p, b2p, out_dim):
    """Single-step forward matching Controller.forward(x, last_read)."""
    xr = jnp.concatenate([x, last_read], axis=-1)     # (B, Dx+Dr), tiny
    return controller_forward_seq(xr[None], w1, b1, w2p, b2p, out_dim)[0]


def init_params(key, input_size, output_size, hidden_size):
    """Matches the PyTorch module: xavier_uniform_(gain=1) weights,
    normal_(std=0.01) biases.  Weights are transposed to (in, out) ONCE and
    layer-2's columns are zero-padded to a multiple of 128 ONCE, so the
    kernel does plain lane-dense `act @ W + b` on the MXU.

    Returns (w1, b1, w2, b2, w2_padded, b2_padded); the unpadded pair is only
    used by the pure-JAX reference."""
    k1, k2, k3, k4 = jax.random.split(key, 4)
    bound1 = math.sqrt(6.0 / (input_size + hidden_size))
    w1_t = jax.random.uniform(k1, (hidden_size, input_size),
                              minval=-bound1, maxval=bound1, dtype=jnp.float32)
    b1 = 0.01 * jax.random.normal(k2, (hidden_size,), dtype=jnp.float32)
    bound2 = math.sqrt(6.0 / (hidden_size + output_size))
    w2_t = jax.random.uniform(k3, (output_size, hidden_size),
                              minval=-bound2, maxval=bound2, dtype=jnp.float32)
    b2 = 0.01 * jax.random.normal(k4, (output_size,), dtype=jnp.float32)

    w1 = w1_t.T                      # (Din, H)
    b1 = b1.reshape(1, -1)           # (1, H)
    w2 = w2_t.T                      # (H, O)
    b2 = b2.reshape(1, -1)           # (1, O)

    o_pad = _round_up(output_size, _LANE)
    w2p = jnp.pad(w2, ((0, 0), (0, o_pad - output_size)))
    b2p = jnp.pad(b2, ((0, 0), (0, o_pad - output_size)))
    return w1, b1, w2, b2, w2p, b2p


def reference_forward(x, last_read, w1, b1, w2, b2):
    xx = jnp.concatenate([x, last_read], axis=1)
    h = jax.nn.sigmoid(xx @ w1 + b1)
    return jax.nn.sigmoid(h @ w2 + b2)


if __name__ == "__main__":
    # Small shapes consistent with an NTM controller.
    batch = 2
    x_dim = 8
    read_dim = 8
    input_size = x_dim + read_dim      # 16
    hidden_size = 32
    output_size = 8
    T = 8                              # fused timesteps for the seq variant

    key = jax.random.PRNGKey(0)
    kx, kr, kp, kt = jax.random.split(key, 4)
    x = jax.random.normal(kx, (batch, x_dim), dtype=jnp.float32)
    last_read = jax.random.normal(kr, (batch, read_dim), dtype=jnp.float32)
    w1, b1, w2, b2, w2p, b2p = init_params(kp, input_size, output_size,
                                           hidden_size)

    # 1) Single-step forward (exact module semantics).
    out = controller_forward(x, last_read, w1, b1, w2p, b2p, output_size)
    out = jax.block_until_ready(out)
    ref = reference_forward(x, last_read, w1, b1, w2, b2)
    assert out.shape == (batch, output_size)
    assert jnp.allclose(out, ref, atol=1e-5, rtol=1e-5)

    # 2) Fused multi-timestep forward: one pallas_call, single grid step,
    #    all T*B rows in one pair of MXU matmuls, lane-dense output.
    xs = jax.random.normal(kt, (T, batch, x_dim), dtype=jnp.float32)
    rs = jax.random.normal(jax.random.fold_in(kt, 1),
                           (T, batch, read_dim), dtype=jnp.float32)
    xr_seq = jnp.concatenate([xs, rs], axis=-1)
    out_seq = jax.block_until_ready(
        controller_forward_seq(xr_seq, w1, b1, w2p, b2p, output_size))
    ref_seq = jax.vmap(
        lambda a, b: reference_forward(a, b, w1, b1, w2, b2))(xs, rs)
    assert out_seq.shape == (T, batch, output_size)
    assert jnp.allclose(out_seq, ref_seq, atol=1e-5, rtol=1e-5)

    print("KERNEL_OK")
</pallas_src>

<mosaic_0001>
module attributes {stable_mosaic.version = 11 : i64} {
  func.func @_controller_mlp_kernel(%arg0: i32, %arg1: memref<8x16xf32, #tpu.memory_space<vmem>>, %arg2: memref<16x32xf32, #tpu.memory_space<vmem>>, %arg3: memref<1x32xf32, #tpu.memory_space<vmem>>, %arg4: memref<32x128xf32, #tpu.memory_space<vmem>>, %arg5: memref<1x128xf32, #tpu.memory_space<vmem>>, %arg6: memref<8x128xf32, #tpu.memory_space<vmem>>) attributes {dimension_semantics = [#tpu.dimension_semantics<arbitrary>], iteration_bounds = array<i64: 1>, scalar_prefetch = 0 : i64, scratch_operands = 0 : i64, tpu.core_type = #tpu.core_type<tc>, window_params = [{transform_indices = @transform_0, window_bounds = array<i64: 8, 16>}, {pipeline_mode = #tpu.pipeline_mode<synchronous>, transform_indices = @transform_1, window_bounds = array<i64: 16, 32>}, {pipeline_mode = #tpu.pipeline_mode<synchronous>, transform_indices = @transform_2, window_bounds = array<i64: 1, 32>}, {pipeline_mode = #tpu.pipeline_mode<synchronous>, transform_indices = @transform_3, window_bounds = array<i64: 32, 128>}, {pipeline_mode = #tpu.pipeline_mode<synchronous>, transform_indices = @transform_4, window_bounds = array<i64: 1, 128>}, {transform_indices = @transform_5, window_bounds = array<i64: 8, 128>}]} {
    %c0 = arith.constant 0 : index
    %c0_0 = arith.constant 0 : index
    %0 = vector.load %arg1[%c0, %c0_0] : memref<8x16xf32, #tpu.memory_space<vmem>>, vector<8x16xf32>
    %c0_1 = arith.constant 0 : index
    %c0_2 = arith.constant 0 : index
    %1 = vector.load %arg2[%c0_1, %c0_2] : memref<16x32xf32, #tpu.memory_space<vmem>>, vector<16x32xf32>
    %cst = arith.constant dense<0.000000e+00> : vector<8x32xf32>
    %2 = tpu.matmul %0, %1, %cst {dimension_numbers = #tpu.dot_dimension_numbers<[1], [0], [0], [1], [0, 0, 1, 1], [], []>} : vector<8x16xf32>, vector<16x32xf32>, vector<8x32xf32> -> vector<8x32xf32>
    %c0_3 = arith.constant 0 : index
    %c0_4 = arith.constant 0 : index
    %3 = vector.load %arg3[%c0_3, %c0_4] : memref<1x32xf32, #tpu.memory_space<vmem>>, vector<1x32xf32>
    %4 = vector.broadcast %3 : vector<1x32xf32> to vector<8x32xf32>
    %5 = arith.addf %2, %4 : vector<8x32xf32>
    %6 = arith.negf %5 : vector<8x32xf32>
    %7 = math.exp %6 : vector<8x32xf32>
    %cst_5 = arith.constant 1.000000e+00 : f32
    %8 = vector.broadcast %cst_5 : f32 to vector<8x32xf32>
    %9 = arith.addf %8, %7 : vector<8x32xf32>
    %10 = arith.divf %8, %9 : vector<8x32xf32>
    %c0_6 = arith.constant 0 : index
    %c0_7 = arith.constant 0 : index
    %11 = vector.load %arg4[%c0_6, %c0_7] : memref<32x128xf32, #tpu.memory_space<vmem>>, vector<32x128xf32>
    %cst_8 = arith.constant dense<0.000000e+00> : vector<8x128xf32>
    %12 = tpu.matmul %10, %11, %cst_8 {dimension_numbers = #tpu.dot_dimension_numbers<[1], [0], [0], [1], [0, 0, 1, 1], [], []>} : vector<8x32xf32>, vector<32x128xf32>, vector<8x128xf32> -> vector<8x128xf32>
    %c0_9 = arith.constant 0 : index
    %c0_10 = arith.constant 0 : index
    %13 = vector.load %arg5[%c0_9, %c0_10] : memref<1x128xf32, #tpu.memory_space<vmem>>, vector<1x128xf32>
    %14 = vector.broadcast %13 : vector<1x128xf32> to vector<8x128xf32>
    %15 = arith.addf %12, %14 : vector<8x128xf32>
    %16 = arith.negf %15 : vector<8x128xf32>
    %17 = math.exp %16 : vector<8x128xf32>
    %cst_11 = arith.constant 1.000000e+00 : f32
    %18 = vector.broadcast %cst_11 : f32 to vector<8x128xf32>
    %19 = arith.addf %18, %17 : vector<8x128xf32>
    %20 = arith.divf %18, %19 : vector<8x128xf32>
    %c0_12 = arith.constant 0 : index
    %c0_13 = arith.constant 0 : index
    %21 = vector.load %arg6[%c0_12, %c0_13] : memref<8x128xf32, #tpu.memory_space<vmem>>, vector<8x128xf32>
    tpu.vector_store %arg6[%c0_12, %c0_13], %20 {strides = array<i32>} : memref<8x128xf32, #tpu.memory_space<vmem>>, vector<8x128xf32>,
    return
  }
  func.func @transform_0(%arg0: i32) -> (i32, i32) {
    %c0_i32 = arith.constant 0 : i32
    %c0_i32_0 = arith.constant 0 : i32
    return %arg0, %c0_i32 : i32, i32
  }
  func.func @transform_1(%arg0: i32) -> (i32, i32) {
    %c0_i32 = arith.constant 0 : i32
    %c0_i32_0 = arith.constant 0 : i32
    %c0_i32_1 = arith.constant 0 : i32
    return %c0_i32, %c0_i32_0 : i32, i32
  }
  func.func @transform_2(%arg0: i32) -> (i32, i32) {
    %c0_i32 = arith.constant 0 : i32
    %c0_i32_0 = arith.constant 0 : i32
    %c0_i32_1 = arith.constant 0 : i32
    return %c0_i32, %c0_i32_0 : i32, i32
  }
  func.func @transform_3(%arg0: i32) -> (i32, i32) {
    %c0_i32 = arith.constant 0 : i32
    %c0_i32_0 = arith.constant 0 : i32
    %c0_i32_1 = arith.constant 0 : i32
    return %c0_i32, %c0_i32_0 : i32, i32
  }
  func.func @transform_4(%arg0: i32) -> (i32, i32) {
    %c0_i32 = arith.constant 0 : i32
    %c0_i32_0 = arith.constant 0 : i32
    %c0_i32_1 = arith.constant 0 : i32
    return %c0_i32, %c0_i32_0 : i32, i32
  }
  func.func @transform_5(%arg0: i32) -> (i32, i32) {
    %c0_i32 = arith.constant 0 : i32
    %c0_i32_0 = arith.constant 0 : i32
    return %arg0, %c0_i32 : i32, i32
  }
}

</mosaic_0001>

<bundles_post_ra>
// kernel: tpu_custom_call.1
= control target key start
LH: loop header
LB: loop body
LE: loop exit
PB: predicated region body
PF: predicated region fallthrough
CT: control target
= control target key end

     0   :  { %10 = vsyncpa [#allocation3], 0  ;;  %s509_s0 = inlined_call_operand.hbm [shape: f32[8,16], index: 0, kind: input, shape index: {}]   ;;  %s510_s1 = inlined_call_operand.hbm [shape: f32[16,32], index: 1, kind: input, shape index: {}]   ;;  %s511_s2 = inlined_call_operand.vmem [shape: f32[1,32], index: 2, kind: input, shape index: {}]   ;;  %s512_s3 = inlined_call_operand.hbm [shape: f32[32,128], index: 3, kind: input, shape index: {}]   ;;  %s513_s4 = inlined_call_operand.vmem [shape: f32[1,128], index: 4, kind: input, shape index: {}]   ;;  %s514_s5 = inlined_call_operand.hbm [shape: f32[8,128], index: 5, kind: output, shape index: {}]  }
   0x1   :  { %11 = vsyncpa [#allocation6], 0 }
   0x2   :  { %12 = vsyncpa [#allocation4], 0  ;;  %s410_s18 = smov [#allocation5]   ;;  %s316_s22 = scalar_lea.hbm %s510_s1, 256 }
   0x3   :  { %s28_s19 = sshll.u32 %s410_s18, 4  ;;  %p317_p0 = scmp.ne.s32.totalorder %s510_s1, %s316_s22  ;;  %s29_s19 = int_to_ptr.vmem [resolvable:$true] %s28_s19 }
   0x4   :  { %p320_p1 = scmp.lt.u32.totalorder %s316_s22, %s510_s1 }
   0x6   :  { %p322_p2 = pnand %p320_p1, %p317_p0 }
   0x8   :  { %325 = shalt.err (!%p322_p2)
}
   0x9   :  { %s326_s27 = scalar_lea.vmem %s29_s19, 256  ;;  %p331_p4 = scmp.lt.s32.totalorder %s29_s19, %s29_s19 }
   0xa   :  { %p327_p3 = scmp.ne.s32.totalorder %s29_s19, %s326_s27  ;;  %p332_p5 = scmp.lt.s32.totalorder %s326_s27, %s326_s27 }
   0xc   :  { %p333_p6 = por %p332_p5, %p331_p4 }
   0xe   :  { %p334_p7 = pnand %p333_p6, %p327_p3 }
  0x10   :  { %337 = shalt.err (!%p334_p7)
}
  0x11   :  { %s411_s28 = smov 128   ;;  %s412_s29 = smov 8  }
  0x12   :  { %34 = dma.hbm_to_vmem [thread:$0]  %s510_s1, 256, %s29_s19, [#allocation6], %s411_s28, %s411_s28, %s412_s29  }
  0x13   :  { %s413_s7 = smov [#allocation2]   ;;  %s414_s9 = smov [#allocation7]  }
  0x14   :  { %s19_s8 = sshll.u32 %s413_s7, 4  ;;  %s42_s10 = sshll.u32 %s414_s9, 4  ;;  %s20_s8 = int_to_ptr.vmem [resolvable:$true] %s19_s8  ;;  %s43_s10 = int_to_ptr.vmem [resolvable:$true] %s42_s10 }
  0x15   :  { %s338_s13 = scalar_lea.hbm %s509_s0, 128 }
  0x16   :  { %p339_p8 = scmp.ne.s32.totalorder %s509_s0, %s338_s13  ;;  %p342_p9 = scmp.lt.u32.totalorder %s338_s13, %s509_s0 }
  0x18   :  { %p344_p10 = pnand %p342_p9, %p339_p8 }
  0x1a   :  { %347 = shalt.err (!%p344_p10)
}
  0x1b   :  { %s348_s1 = scalar_lea.vmem %s20_s8, 128  ;;  %p353_p12 = scmp.lt.s32.totalorder %s20_s8, %s20_s8 }
  0x1c   :  { %p349_p11 = scmp.ne.s32.totalorder %s20_s8, %s348_s1  ;;  %p354_p13 = scmp.lt.s32.totalorder %s348_s1, %s348_s1 }
  0x1e   :  { %p355_p0 = por %p354_p13, %p353_p12 }
  0x20   :  { %p356_p1 = pnand %p355_p0, %p349_p11 }
  0x22   :  { %359 = shalt.err (!%p356_p1)
}
  0x23   :  { %22 = dma.hbm_to_vmem [thread:$0]  %s509_s0, 128, %s20_s8, [#allocation3]  }
  0x24   :  { %s360_s22 = scalar_lea.hbm %s512_s3, 512 }
  0x25   :  { %p361_p2 = scmp.ne.s32.totalorder %s512_s3, %s360_s22  ;;  %p364_p3 = scmp.lt.u32.totalorder %s360_s22, %s512_s3 }
  0x27   :  { %p366_p4 = pnand %p364_p3, %p361_p2 }
  0x29   :  { %369 = shalt.err (!%p366_p4)
}
  0x2a   :  { %s370_s27 = scalar_lea.vmem %s43_s10, 512  ;;  %p375_p6 = scmp.lt.s32.totalorder %s43_s10, %s43_s10 }
  0x2b   :  { %p371_p5 = scmp.ne.s32.totalorder %s43_s10, %s370_s27  ;;  %p376_p7 = scmp.lt.s32.totalorder %s370_s27, %s370_s27 }
  0x2d   :  { %p377_p8 = por %p376_p7, %p375_p6 }
  0x2f   :  { %p378_p9 = pnand %p377_p8, %p371_p5 }
  0x31   :  { %381 = shalt.err (!%p378_p9)
}
  0x32   :  { %48 = dma.hbm_to_vmem [thread:$0]  %s512_s3, 512, %s43_s10, [#allocation6], %s411_s28, %s411_s28, %s412_s29  }
  0x33   :  { %404 = dma.done.wait [#allocation3], 128  }
  0x34   :  { %405 = vsyncadd [#allocation3], 4294967168 }
  0x35   :  { %406 = dma.done.wait [#allocation6], 768  }
  0x36   :  { %407 = vsyncadd [#allocation6], 4294966528  ;;  %v415_v0 = vmov 0.0|0.0   ;;  %vm416_vm0 = vmmov 0   ;;  %v417_v1 = vmov 0.0   ;;  %v61_v2 = vld [vmem:[#allocation5] sm:$0xff] }
  0x37   :  { %290 = vmatprep.subr.bf16.mxu0 %v415_v0  ;;  %276 = vmatprep.mubr.msk.f32.mxu0 %vm416_vm0, %v417_v1  ;;  %v62_v3 = vld [vmem:[#allocation5 + $0x8] sm:$0xff]  ;;  %v60_v5 = vld [vmem:[#allocation2] sm:$0xff]  ;;  %vm70_vm1 = vcmask 130048   ;;  %v150_v6 = vld [vmem:[#allocation7] sm:$0xff]  ;;  %vm161_vm2 = vcmask 261120  }
  0x38   :  { %293 = vmatprep.subr.bf16.mxu1 %v415_v0  ;;  %287 = vmatprep.mubr.msk.f32.mxu1 %vm416_vm0, %v417_v1  ;;  %v291_v4 = vpack.c.bf16 %v62_v3, %v61_v2  ;;  %v151_v7 = vld [vmem:[#allocation7 + $0x8] sm:$0xff]  ;;  %v152_v8 = vld [vmem:[#allocation7 + $0x10] sm:$0xff]  ;;  %v153_v10 = vld [vmem:[#allocation7 + $0x18] sm:$0xff] }
  0x39   :  { %v294_v9 = vpack.c.bf16 %v151_v7, %v150_v6  ;;  %v297_v11 = vpack.c.bf16 %v153_v10, %v152_v8  ;;  %v258_v12 = vld [vmem:[%s511_s2] ss:$0 sm:$0xff]  ;;  %s418_s2 = smov [#allocation8]  }
  0x3a   :  { %292 = vmatpush3.bf16.msra.mxu0 %v291_v4  ;;  %v261_v20 = vld [vmem:[%s513_s4] ss:$0 sm:$0xff]  ;;  %s248_s7 = sshll.u32 %s418_s2, 4  ;;  %s249_s7 = int_to_ptr.vmem [resolvable:$true] %s248_s7 }
  0x3b   :  { %295 = vmatpush3.bf16.msra.mxu1 %v294_v9  ;;  %s382_s8 = scalar_lea.vmem %s249_s7, 128  ;;  %p387_p11 = scmp.lt.s32.totalorder %s249_s7, %s249_s7 }
  0x3c   :  { %296 = vmatprep.subr.bf16.mxu1 %v415_v0  ;;  %p383_p10 = scmp.ne.s32.totalorder %s249_s7, %s382_s8  ;;  %p388_p12 = scmp.lt.s32.totalorder %s382_s8, %s382_s8 }
  0x3d   :  { %277 = vmatmul.mubr.msk.f32.vlgmr.msra.gmra.mrb[0].mxu0 %vm70_vm1, %v60_v5 }
  0x3e   :  { %p389_p13 = por %p388_p12, %p387_p11 }
  0x3f   :  { %298 = vmatpush3.bf16.msra.mxu1 %v297_v11 }
  0x40   :  { %p390_p0 = pnand %p389_p13, %p383_p10 }
 0x110   :  { %v140_v13 = vpop.f32.mrb[0].mxu0 }
 0x111   :  { %v141_v14 = vadd.f32 %v258_v12, %v140_v13  ;;  %v278_v15 = vpop.f32.mrb[1].mxu0 }
 0x113   :  { %v260_v16 = vmul.f32 -1.442695, %v141_v14 }
 0x115   :  { %308 = vpow2.f32 %v260_v16 }
 0x11f   :  { %v309_v17 = vpop.eup %308 }
 0x120   :  { %v147_v18 = vadd.f32 1.0, %v309_v17 }
 0x122   :  { %310 = vrcp.f32 %v147_v18 }
 0x12c   :  { %v311_v19 = vpop.eup %310 }
 0x12d   :  { %288 = vmatmul.mubr.msk.f32.vlgmr.msra.gmra.mrb[0].mxu1 %vm161_vm2, %v311_v19 }
 0x200   :  { %v231_v21 = vpop.f32.mrb[0].mxu1 }
 0x201   :  { %v232_v22 = vadd.f32 %v261_v20, %v231_v21  ;;  %v289_v23 = vpop.f32.mrb[1].mxu1 }
 0x203   :  { %v263_v24 = vmul.f32 -1.442695, %v232_v22 }
 0x205   :  { %312 = vpow2.f32 %v263_v24 }
 0x20f   :  { %v313_v25 = vpop.eup %312 }
 0x210   :  { %v238_v26 = vadd.f32 1.0, %v313_v25 }
 0x212   :  { %314 = vrcp.f32 %v238_v26 }
 0x21c   :  { %v315_v27 = vpop.eup %314 }
 0x21d   :  { %241 = vst [vmem:[#allocation8] sm:$0xff] %v315_v27 }
 0x21e   :  { %393 = shalt.err (!%p390_p0)
}
 0x21f   :  { %s394_s10 = scalar_lea.hbm %s514_s5, 128 }
 0x220   :  { %p395_p1 = scmp.ne.s32.totalorder %s514_s5, %s394_s10  ;;  %p398_p2 = scmp.lt.u32.totalorder %s394_s10, %s514_s5 }
 0x222   :  { %p400_p3 = pnand %p398_p2, %p395_p1 }
 0x224   :  { %403 = shalt.err (!%p400_p3)
}
 0x225   :  { %251 = dma.vmem_to_hbm [thread:$0]  %s249_s7, 128, %s514_s5, [#allocation4]  }
 0x226   :  { %408 = dma.done.wait [#allocation4], 128  }
 0x227   :  { %409 = vsyncadd [#allocation4], 4294967168 }
 0x228   :  { %255 = vsyncpa [#allocation3], 1 }
 0x229   :  { %256 = vsyncpa [#allocation6], 1 }
 0x22a   :  { %257 = vsyncpa [#allocation4], 1 }

</bundles_post_ra>
